<compile_context>
chip_gen: v7x
topology: tpu7x:2x2x1
jax: 0.10.0
libtpu: 0.0.40
codegen_flags: <defaults>
</compile_context>

<pallas_src>
import functools

import jax
import jax.numpy as jnp
from jax.experimental import pallas as pl
from jax.experimental.pallas import tpu as pltpu


def _round_up(x, m):
    return (x + m - 1) // m * m


def _mean_score_kernel(sc_ref, out_ref, *, inv_s):
    # sc_ref:  (tile_s, tile_b) f32/bf16  per-token scores (fc bias already folded in)
    # out_ref: (1, tile_b)      f32       resident accumulator / final output
    s_idx = pl.program_id(1)

    @pl.when(s_idx == 0)
    def _():
        out_ref[...] = jnp.zeros_like(out_ref)

    # Partial sum over this S tile; always accumulate in f32.
    out_ref[...] += jnp.sum(sc_ref[...].astype(jnp.float32), axis=0, keepdims=True)

    @pl.when(s_idx == pl.num_programs(1) - 1)
    def _():
        out_ref[...] *= inv_s


def baseline_forward(x_tokens, emb_table, fc_w, fc_b, *,
                     tile_s_pref=512, tile_b_pref=1024,
                     scores_dtype=jnp.float32):
    """Forward pass of the Baseline module.

    x_tokens:  int32 [S, B] token ids (seq-first, like the torch module).
    emb_table: f32 [V, D]; fc_w: f32 [1, D] (torch Linear layout); fc_b: f32 [1].
    scores_dtype: dtype of the per-token score stream fed to the kernel
      (float32 is exact; bfloat16 halves the kernel's HBM read traffic at ~4e-3
      relative quantization on per-token scores, accumulation stays f32).
    Returns f32 [B], matching `self.fc(embedded.mean(0)).squeeze(1)`.
    """
    S, B = x_tokens.shape
    V, D = emb_table.shape

    # Hoist the FC (and its bias) onto the embedding table: one V-length matvec.
    scores = (emb_table.astype(jnp.float32) @ fc_w.reshape(D).astype(jnp.float32)
              + fc_b.astype(jnp.float32)[0])                              # (V,)
    # Gather one scalar per token (XLA gather; see TODO above).
    tok_scores = jnp.take(scores, x_tokens, axis=0).astype(scores_dtype)  # (S, B)

    # --- tiling -------------------------------------------------------------
    # Last-two block dims must be (8, 128)-aligned; we pad the array instead of
    # ever falling back to a full-extent (possibly VMEM-busting) tile.
    tile_s = min(tile_s_pref, _round_up(S, 8))
    tile_b = min(tile_b_pref, _round_up(B, 128))
    b_pad = _round_up(B, tile_b)
    # v7x megacore: make sure the leading "parallel" B axis has >= 2 tiles when
    # there is enough batch to split, so both TensorCores get work
    # (no-op cost on single-TC v5e/v6e).
    if b_pad >= 256 and b_pad // tile_b < 2:
        tile_b = max(128, (b_pad // 2) // 128 * 128)
        b_pad = _round_up(B, tile_b)
    s_pad = _round_up(S, tile_s)

    if (s_pad, b_pad) != (S, B):
        # Zero padding contributes exactly zero to the sums; inv_s stays 1/true_S.
        tok_scores = jnp.pad(tok_scores, ((0, s_pad - S), (0, b_pad - B)))

    grid = (b_pad // tile_b, s_pad // tile_s)   # (parallel B, reduction S)

    kernel = functools.partial(_mean_score_kernel, inv_s=float(1.0 / S))

    # Per-tile VMEM: tile_s*tile_b*4 B (<= 2 MiB at defaults), double-buffered ->
    # well under the 16/32/32 MiB scoped-VMEM defaults (v5e/v6e/v7x) and the
    # 64 MiB physical VMEM budget of v7x; no vmem_limit_bytes override needed.
    out = pl.pallas_call(
        kernel,
        out_shape=jax.ShapeDtypeStruct((1, b_pad), jnp.float32),
        grid_spec=pltpu.PrefetchScalarGridSpec(
            num_scalar_prefetch=0,
            grid=grid,
            in_specs=[pl.BlockSpec((tile_s, tile_b), lambda i, j: (j, i))],
            # Output block index is constant along the S axis -> the (1, tile_b)
            # block stays resident in VMEM and doubles as the accumulator.
            out_specs=pl.BlockSpec((1, tile_b), lambda i, j: (0, i)),
        ),
        compiler_params=pltpu.CompilerParams(
            dimension_semantics=("parallel", "arbitrary")),
    )(tok_scores)

    return out[0, :B]


def _reference(x_tokens, emb_table, fc_w, fc_b):
    embedded = jnp.take(emb_table, x_tokens, axis=0)   # (S, B, D)
    average = embedded.mean(axis=0)                    # (B, D)
    return (average @ fc_w.T + fc_b)[:, 0]             # (B,)


if __name__ == "__main__":
    key = jax.random.PRNGKey(0)
    k_emb, k_w, k_b, k_x = jax.random.split(key, 4)

    # Small, module-consistent shapes (seq-first token ids, as torchtext feeds them).
    seq_len, batch, emb_dim, vocab_size = 8, 4, 32, 50
    emb_table = jax.random.normal(k_emb, (vocab_size, emb_dim), dtype=jnp.float32)
    fc_w = jax.random.normal(k_w, (1, emb_dim), dtype=jnp.float32) * 0.1
    fc_b = jax.random.normal(k_b, (1,), dtype=jnp.float32)
    x_tokens = jax.random.randint(k_x, (seq_len, batch), 0, vocab_size, dtype=jnp.int32)

    out = baseline_forward(x_tokens, emb_table, fc_w, fc_b)
    jax.block_until_ready(out)
    ref = _reference(x_tokens, emb_table, fc_w, fc_b)
    assert out.shape == (batch,), out.shape
    assert jnp.allclose(out, ref, atol=1e-5, rtol=1e-5), (out, ref)

    # Shapes that exercise multiple B tiles (v7x >=2-tile split), the S reduction
    # axis, and the zero-padding path (S=1000 -> 1024, B=600 -> 768 @ tile_b=256).
    ks = jax.random.split(jax.random.PRNGKey(1), 4)
    S2, B2, D2, V2 = 1000, 600, 32, 300
    emb2 = jax.random.normal(ks[0], (V2, D2), dtype=jnp.float32)
    w2 = jax.random.normal(ks[1], (1, D2), dtype=jnp.float32) * 0.1
    b2 = jax.random.normal(ks[2], (1,), dtype=jnp.float32)
    x2 = jax.random.randint(ks[3], (S2, B2), 0, V2, dtype=jnp.int32)

    out2 = baseline_forward(x2, emb2, w2, b2)
    jax.block_until_ready(out2)
    ref2 = _reference(x2, emb2, w2, b2)
    assert out2.shape == (B2,), out2.shape
    assert jnp.allclose(out2, ref2, atol=1e-4, rtol=1e-4), (out2, ref2)

    # Bandwidth-saving variant from the perf review: bf16 score stream, f32 accum.
    out3 = baseline_forward(x2, emb2, w2, b2, scores_dtype=jnp.bfloat16)
    jax.block_until_ready(out3)
    assert out3.shape == (B2,), out3.shape
    assert jnp.allclose(out3, ref2, atol=1e-2, rtol=0), (out3, ref2)

    print("KERNEL_OK")
</pallas_src>

<mosaic_0001>
module attributes {stable_mosaic.version = 11 : i64} {
  func.func @_mean_score_kernel(%arg0: i32, %arg1: i32, %arg2: memref<8x128xf32, #tpu.memory_space<vmem>>, %arg3: memref<1x128xf32, #tpu.memory_space<vmem>>) attributes {dimension_semantics = [#tpu.dimension_semantics<parallel>, #tpu.dimension_semantics<arbitrary>], iteration_bounds = array<i64: 1, 1>, scalar_prefetch = 0 : i64, scratch_operands = 0 : i64, tpu.core_type = #tpu.core_type<tc>, window_params = [{transform_indices = @transform_0, window_bounds = array<i64: 8, 128>}, {transform_indices = @transform_1, window_bounds = array<i64: 1, 128>}]} {
    %c0_i32 = arith.constant 0 : i32
    %0 = arith.cmpi eq, %arg1, %c0_i32 : i32
    %1 = arith.extui %0 : i1 to i32
    %c0_i32_0 = arith.constant 0 : i32
    %2 = arith.cmpi ne, %1, %c0_i32_0 : i32
    scf.if %2 {
      %cst_8 = arith.constant 0.000000e+00 : f32
      %12 = vector.broadcast %cst_8 : f32 to vector<1x128xf32>
      %c0_9 = arith.constant 0 : index
      %c0_10 = arith.constant 0 : index
      %13 = vector.load %arg3[%c0_9, %c0_10] : memref<1x128xf32, #tpu.memory_space<vmem>>, vector<1x128xf32>
      tpu.vector_store %arg3[%c0_9, %c0_10], %12 {strides = array<i32>} : memref<1x128xf32, #tpu.memory_space<vmem>>, vector<1x128xf32>,
    } else {
    }
    %c0 = arith.constant 0 : index
    %c0_1 = arith.constant 0 : index
    %3 = vector.load %arg3[%c0, %c0_1] : memref<1x128xf32, #tpu.memory_space<vmem>>, vector<1x128xf32>
    %c0_2 = arith.constant 0 : index
    %c0_3 = arith.constant 0 : index
    %4 = vector.load %arg2[%c0_2, %c0_3] : memref<8x128xf32, #tpu.memory_space<vmem>>, vector<8x128xf32>
    %cst = arith.constant dense<0.000000e+00> : vector<128xf32>
    %5 = vector.multi_reduction <add>, %4, %cst [0] : vector<8x128xf32> to vector<128xf32>
    %6 = vector.shape_cast %5 : vector<128xf32> to vector<1x128xf32>
    %7 = arith.addf %3, %6 : vector<1x128xf32>
    %c0_4 = arith.constant 0 : index
    %c0_5 = arith.constant 0 : index
    %8 = vector.load %arg3[%c0_4, %c0_5] : memref<1x128xf32, #tpu.memory_space<vmem>>, vector<1x128xf32>
    tpu.vector_store %arg3[%c0_4, %c0_5], %7 {strides = array<i32>} : memref<1x128xf32, #tpu.memory_space<vmem>>, vector<1x128xf32>,
    %c0_i32_6 = arith.constant 0 : i32
    %9 = arith.cmpi eq, %arg1, %c0_i32_6 : i32
    %10 = arith.extui %9 : i1 to i32
    %c0_i32_7 = arith.constant 0 : i32
    %11 = arith.cmpi ne, %10, %c0_i32_7 : i32
    scf.if %11 {
      %c0_8 = arith.constant 0 : index
      %c0_9 = arith.constant 0 : index
      %12 = vector.load %arg3[%c0_8, %c0_9] : memref<1x128xf32, #tpu.memory_space<vmem>>, vector<1x128xf32>
      %cst_10 = arith.constant 1.250000e-01 : f32
      %13 = vector.broadcast %cst_10 : f32 to vector<1x128xf32>
      %14 = arith.mulf %12, %13 : vector<1x128xf32>
      %c0_11 = arith.constant 0 : index
      %c0_12 = arith.constant 0 : index
      %15 = vector.load %arg3[%c0_11, %c0_12] : memref<1x128xf32, #tpu.memory_space<vmem>>, vector<1x128xf32>
      tpu.vector_store %arg3[%c0_11, %c0_12], %14 {strides = array<i32>} : memref<1x128xf32, #tpu.memory_space<vmem>>, vector<1x128xf32>,
    } else {
    }
    return
  }
  func.func @transform_0(%arg0: i32, %arg1: i32) -> (i32, i32) {
    %c0_i32 = arith.constant 0 : i32
    return %arg1, %arg0 : i32, i32
  }
  func.func @transform_1(%arg0: i32, %arg1: i32) -> (i32, i32) {
    %c0_i32 = arith.constant 0 : i32
    %c0_i32_0 = arith.constant 0 : i32
    return %c0_i32, %arg0 : i32, i32
  }
}

</mosaic_0001>

<bundles_post_ra>
// kernel: tpu_custom_call.1
= control target key start
LH: loop header
LB: loop body
LE: loop exit
PB: predicated region body
PF: predicated region fallthrough
CT: control target
= control target key end

     0   :  { %6 = vsyncpa [#allocation3], 0  ;;  %s145_s0 = inlined_call_operand.hbm [shape: f32[8,128], index: 0, kind: input, shape index: {}]   ;;  %s146_s1 = inlined_call_operand.hbm [shape: f32[1,128], index: 1, kind: output, shape index: {}]  }
   0x1   :  { %7 = vsyncpa [#allocation4], 0  ;;  %s108_s6 = smov [#allocation2]   ;;  %s60_s10 = scalar_lea.hbm %s145_s0, 128 }
   0x2   :  { %s14_s7 = sshll.u32 %s108_s6, 4  ;;  %p61_p0 = scmp.ne.s32.totalorder %s145_s0, %s60_s10  ;;  %s15_s7 = int_to_ptr.vmem [resolvable:$true] %s14_s7 }
   0x3   :  { %p64_p1 = scmp.lt.u32.totalorder %s60_s10, %s145_s0 }
   0x5   :  { %p66_p2 = pnand %p64_p1, %p61_p0 }
   0x7   :  { %69 = shalt.err (!%p66_p2)
}
   0x8   :  { %s70_s15 = scalar_lea.vmem %s15_s7, 128  ;;  %p75_p4 = scmp.lt.s32.totalorder %s15_s7, %s15_s7 }
   0x9   :  { %p71_p3 = scmp.ne.s32.totalorder %s15_s7, %s70_s15  ;;  %p76_p5 = scmp.lt.s32.totalorder %s70_s15, %s70_s15 }
   0xb   :  { %p77_p6 = por %p76_p5, %p75_p4 }
   0xd   :  { %p78_p7 = pnand %p77_p6, %p71_p3 }
   0xf   :  { %81 = shalt.err (!%p78_p7)
}
  0x10   :  { %17 = dma.hbm_to_vmem [thread:$0]  %s145_s0, 128, %s15_s7, [#allocation3]  }
  0x11   :  { %104 = dma.done.wait [#allocation3], 128  }
  0x12   :  { %105 = vsyncadd [#allocation3], 4294967168  ;;  %v109_v0 = vmov 0.0   ;;  %v27_v1 = vld [vmem:[#allocation2] sm:$0xff]  ;;  %s110_s18 = smov [#allocation5]  }
  0x13   :  { %25 = vst [vmem:[#allocation5] sm:$0x1] %v109_v0  ;;  %v28_v2 = vrot.slane %v27_v1, 4  ;;  %s48_s19 = sshll.u32 %s110_s18, 4  ;;  %s49_s19 = int_to_ptr.vmem [resolvable:$true] %s48_s19 }
  0x14   :  { %s82_s0 = scalar_lea.vmem %s49_s19, 16  ;;  %s86_s20 = scalar_lea.vmem %s49_s19, 32 }
  0x15   :  { %v29_v3 = vadd.f32 %v28_v2, %v27_v1  ;;  %p83_p8 = scmp.ne.s32.totalorder %s49_s19, %s82_s0  ;;  %p87_p9 = scmp.lt.s32.totalorder %s49_s19, %s49_s19 }
  0x16   :  { %p88_p10 = scmp.lt.s32.totalorder %s86_s20, %s82_s0 }
  0x17   :  { %v30_v4 = vrot.slane %v29_v3, 2 }
  0x18   :  { %p89_p11 = por %p88_p10, %p87_p9 }
  0x19   :  { %v31_v5 = vadd.f32 %v30_v4, %v29_v3 }
  0x1a   :  { %v26_v7 = vld [vmem:[#allocation5] sm:$0x1]  ;;  %p90_p12 = pnand %p89_p11, %p83_p8 }
  0x1b   :  { %v32_v6 = vrot.slane %v31_v5, 1 }
  0x1d   :  { %v33_v8 = vadd.f32 %v32_v6, %v31_v5 }
  0x1f   :  { %v34_v9 = vadd.f32 %v33_v8, %v26_v7 }
  0x21   :  { %35 = vst [vmem:[#allocation5] sm:$0x1] %v34_v9 }
  0x28   :  { %v39_v10 = vld [vmem:[#allocation5] sm:$0x1] }
  0x29   :  { %v40_v11 = vmul.f32 0.125, %v39_v10 }
  0x2b   :  { %41 = vst [vmem:[#allocation5] sm:$0x1] %v40_v11 }
  0x2c   :  { %93 = shalt.err (!%p90_p12)
}
  0x2d   :  { %s94_s23 = scalar_lea.hbm %s146_s1, 16 }
  0x2e   :  { %p95_p13 = scmp.ne.s32.totalorder %s146_s1, %s94_s23  ;;  %p98_p0 = scmp.lt.u32.totalorder %s94_s23, %s146_s1 }
  0x30   :  { %p100_p1 = pnand %p98_p0, %p95_p13 }
  0x32   :  { %103 = shalt.err (!%p100_p1)
}
  0x33   :  { %51 = dma.vmem_to_hbm [thread:$0]  %s49_s19, 16, %s146_s1, [#allocation4]  }
  0x34   :  { %106 = dma.done.wait [#allocation4], 16  }
  0x35   :  { %107 = vsyncadd [#allocation4], 4294967280 }
  0x36   :  { %55 = vsyncpa [#allocation3], 1 }
  0x37   :  { %56 = vsyncpa [#allocation4], 1 }

</bundles_post_ra>
